<compile_context>
chip_gen: v7x
topology: tpu7x:2x2x1
jax: 0.10.0
libtpu: 0.0.40
codegen_flags: <defaults>
</compile_context>

<pallas_src>
import functools
import math

import jax
import jax.numpy as jnp
import numpy as np
from jax.experimental import pallas as pl
from jax.experimental.pallas import tpu as pltpu


def _leaky_relu(v, slope=0.2):
    return jnp.where(v > 0, v, slope * v)


def _make_transition_kernel(K, R):
    RK = R * K
    RKK = R * K * K

    def kernel(x_ref, w1_ref, b1_ref, w2_ref, b2_ref, wo_ref, o_ref):
        cd = w1_ref.dtype
        x = x_ref[...]

        # fc1_1 / fc1_2 (packed along N) -> LeakyReLU   (dropout == identity, eval)
        h = _leaky_relu(
            jnp.dot(x, w1_ref[...], preferred_element_type=jnp.float32)
            + b1_ref[...])
        # fc2_1 / fc2_2 (block-diagonal) -> LeakyReLU
        g = _leaky_relu(
            jnp.dot(h.astype(cd), w2_ref[...], preferred_element_type=jnp.float32)
            + b2_ref[...])
        # out_1 on both branches + the (r,i,j) broadcast-add, folded into a
        # single matmul:  logits[:, r*K*K + i*K + j] = o1[:, i*K+j] + o2[:, r*K+j]
        logits = jnp.dot(g.astype(cd), wo_ref[...],
                         preferred_element_type=jnp.float32)            # (tb, RKK)

        tb = logits.shape[0]
        # Softmax over the last K lanes of each (r,i) group: one reshape to
        # (tb, RK, K), max / exp / sum / normalize there, one reshape back so
        # the store stays flat and lane-dense.
        l3 = logits.reshape(tb, RK, K)
        m = jnp.max(l3, axis=-1, keepdims=True)                         # (tb, RK, 1)
        e3 = jnp.exp(l3 - m)                                            # EUP
        s = jnp.sum(e3, axis=-1, keepdims=True)                         # (tb, RK, 1)
        p3 = e3 * pl.reciprocal(s, approx=True)
        o_ref[...] = p3.reshape(tb, RKK)

    return kernel


def transition_forward(x, params, num_classes, R, *,
                       compute_dtype=jnp.bfloat16, tb_target=512):
    B, dim_in = x.shape
    K = num_classes
    assert R == K, "forward() reshapes out_1 output (K*K) to (R, K) => R must equal K"
    H = params["w11"].shape[1]
    dh2 = params["w21"].shape[1]
    KK = K * K
    RKK = R * K * K
    cd = compute_dtype

    # ---- wrapper-side weight packing (exact copies / zero padding) -------------
    w1 = jnp.concatenate([params["w11"], params["w12"]], axis=1).astype(cd)      # (dim_in, 2H)
    b1 = jnp.concatenate([params["b11"], params["b12"]], axis=1).astype(jnp.float32)
    w2 = jnp.zeros((2 * H, 2 * dh2), cd)
    w2 = w2.at[:H, :dh2].set(params["w21"].astype(cd))
    w2 = w2.at[H:, dh2:].set(params["w22"].astype(cd))                           # blockdiag
    b2 = jnp.concatenate([params["b21"], params["b22"]], axis=1).astype(jnp.float32)

    wo = params["wo1"].astype(cd)                                                # (dh2, K*K)
    lanes = np.arange(RKK)
    tile_idx = lanes % KK                                    # o1 column for flat lane l
    exp_idx = (lanes // KK) * K + (lanes % K)                 # o2 column for flat lane l
    wo_comb = jnp.concatenate([wo[:, tile_idx], wo[:, exp_idx]], axis=0)         # (2*dh2, RKK)

    x_c = x.astype(cd)

    # ---- batch tiling ----------------------------------------------------------
    tb = min(B, tb_target)
    if tb % 8 != 0 or B % tb != 0:   # (8,128) constraint & even split
        tb = B
    grid = (pl.cdiv(B, tb),)

    def _nbytes(shape, dtype):
        return int(np.prod(shape)) * jnp.dtype(dtype).itemsize

    resident = (_nbytes(w1.shape, cd) + _nbytes(b1.shape, jnp.float32)
                + _nbytes(w2.shape, cd) + _nbytes(b2.shape, jnp.float32)
                + _nbytes(wo_comb.shape, cd))
    streamed = _nbytes((tb, dim_in), cd) + _nbytes((tb, RKK), jnp.float32)
    vmem_limit = int(min(64 << 20, max(16 << 20, 2 * resident + 2 * streamed + (4 << 20))))

    flops = 2 * B * (dim_in * 2 * H + 2 * H * 2 * dh2 + 2 * dh2 * RKK)
    cost = pl.CostEstimate(
        flops=flops,
        transcendentals=B * RKK,
        bytes_accessed=_nbytes(x_c.shape, cd) + resident + _nbytes((B, RKK), jnp.float32),
    )

    kernel = _make_transition_kernel(K, R)

    out_flat = pl.pallas_call(
        kernel,
        out_shape=jax.ShapeDtypeStruct((B, RKK), jnp.float32),
        grid_spec=pltpu.PrefetchScalarGridSpec(
            num_scalar_prefetch=0,
            grid=grid,
            in_specs=[
                pl.BlockSpec((tb, dim_in), lambda i: (i, 0)),          # x tile (streamed)
                pl.BlockSpec((dim_in, 2 * H), lambda i: (0, 0)),       # W1 (resident)
                pl.BlockSpec((1, 2 * H), lambda i: (0, 0)),            # b1
                pl.BlockSpec((2 * H, 2 * dh2), lambda i: (0, 0)),      # W2
                pl.BlockSpec((1, 2 * dh2), lambda i: (0, 0)),          # b2
                pl.BlockSpec((2 * dh2, RKK), lambda i: (0, 0)),        # Wout
            ],
            out_specs=pl.BlockSpec((tb, RKK), lambda i: (i, 0)),       # flat, lane-dense
        ),
        compiler_params=pltpu.CompilerParams(
            dimension_semantics=("parallel",),
            vmem_limit_bytes=vmem_limit,
        ),
        cost_estimate=cost,
    )(x_c, w1, b1, w2, b2, wo_comb)

    # glue reshape (mirror of torch .reshape + broadcast target shape)
    return out_flat.reshape(B, R, K, K)


def init_params(key, dim_in, dim_hidden, num_classes, R):
    """Deterministic kaiming-uniform-like init (matches torch init scheme, bias=0)."""
    K = num_classes
    dh2 = dim_hidden // 2
    keys = jax.random.split(key, 6)

    def kaiming(k, fan_in, fan_out):
        bound = math.sqrt(6.0 / fan_in)
        # stored transposed relative to torch: (in, out)
        return jax.random.uniform(k, (fan_in, fan_out), jnp.float32, -bound, bound)

    return dict(
        w11=kaiming(keys[0], dim_in, dim_hidden),
        b11=jnp.zeros((1, dim_hidden), jnp.float32),
        w21=kaiming(keys[1], dim_hidden, dh2),
        b21=jnp.zeros((1, dh2), jnp.float32),
        w12=kaiming(keys[2], dim_in, dim_hidden),
        b12=jnp.zeros((1, dim_hidden), jnp.float32),
        w22=kaiming(keys[3], dim_hidden, dh2),
        b22=jnp.zeros((1, dh2), jnp.float32),
        wo1=kaiming(keys[4], dh2, K * K),            # out_1 (bias=False)
        wo2=kaiming(keys[5], dh2, K * R),            # out_2: created, unused (as in source)
    )


def transition_reference(x, p, num_classes, R, compute_dtype=jnp.bfloat16):
    """Pure-JAX reference of the same (eval-mode) forward, same matmul precision."""
    K = num_classes

    def lrelu(v):
        return jnp.where(v > 0, v, 0.2 * v)

    def dot(a, b):
        return jnp.dot(a.astype(compute_dtype), b.astype(compute_dtype),
                       preferred_element_type=jnp.float32)

    h1 = lrelu(dot(x, p["w11"]) + p["b11"])
    h1 = lrelu(dot(h1, p["w21"]) + p["b21"])
    o1 = dot(h1, p["wo1"])
    h2 = lrelu(dot(x, p["w12"]) + p["b12"])
    h2 = lrelu(dot(h2, p["w22"]) + p["b22"])
    o2 = dot(h2, p["wo1"])
    out = o1.reshape(-1, 1, K, K) + o2.reshape(-1, R, 1, K)
    return jax.nn.softmax(out, axis=3)


if __name__ == "__main__":
    # small shapes consistent with the module (FC_2=True path)
    B, dim_in, dim_hidden, num_classes, R = 8, 64, 32, 4, 4

    key = jax.random.PRNGKey(0)
    kx, kp = jax.random.split(key)
    x = jax.random.normal(kx, (B, dim_in), jnp.float32)
    params = init_params(kp, dim_in, dim_hidden, num_classes, R)

    fwd = jax.jit(functools.partial(transition_forward, num_classes=num_classes, R=R))
    prob = jax.block_until_ready(fwd(x, params))

    ref = jax.block_until_ready(transition_reference(x, params, num_classes, R))

    assert prob.shape == (B, R, num_classes, num_classes)
    # tolerance covers bf16 MXU inputs + approximate EUP reciprocal in the softmax
    np.testing.assert_allclose(np.asarray(prob), np.asarray(ref), rtol=5e-3, atol=5e-3)
    np.testing.assert_allclose(np.asarray(prob).sum(-1), 1.0, rtol=5e-3, atol=5e-3)

    print("KERNEL_OK")
</pallas_src>

<mosaic_0001>
module attributes {stable_mosaic.version = 11 : i64} {
  func.func @kernel(%arg0: i32, %arg1: memref<8x64xbf16, #tpu.memory_space<vmem>>, %arg2: memref<64x64xbf16, #tpu.memory_space<vmem>>, %arg3: memref<1x64xf32, #tpu.memory_space<vmem>>, %arg4: memref<64x32xbf16, #tpu.memory_space<vmem>>, %arg5: memref<1x32xf32, #tpu.memory_space<vmem>>, %arg6: memref<32x64xbf16, #tpu.memory_space<vmem>>, %arg7: memref<8x64xf32, #tpu.memory_space<vmem>>) attributes {dimension_semantics = [#tpu.dimension_semantics<parallel>], iteration_bounds = array<i64: 1>, scalar_prefetch = 0 : i64, scratch_operands = 0 : i64, tpu.core_type = #tpu.core_type<tc>, window_params = [{transform_indices = @transform_0, window_bounds = array<i64: 8, 64>}, {pipeline_mode = #tpu.pipeline_mode<synchronous>, transform_indices = @transform_1, window_bounds = array<i64: 64, 64>}, {pipeline_mode = #tpu.pipeline_mode<synchronous>, transform_indices = @transform_2, window_bounds = array<i64: 1, 64>}, {pipeline_mode = #tpu.pipeline_mode<synchronous>, transform_indices = @transform_3, window_bounds = array<i64: 64, 32>}, {pipeline_mode = #tpu.pipeline_mode<synchronous>, transform_indices = @transform_4, window_bounds = array<i64: 1, 32>}, {pipeline_mode = #tpu.pipeline_mode<synchronous>, transform_indices = @transform_5, window_bounds = array<i64: 32, 64>}, {transform_indices = @transform_6, window_bounds = array<i64: 8, 64>}]} {
    %c0 = arith.constant 0 : index
    %c0_0 = arith.constant 0 : index
    %0 = vector.load %arg1[%c0, %c0_0] : memref<8x64xbf16, #tpu.memory_space<vmem>>, vector<8x64xbf16>
    %c0_1 = arith.constant 0 : index
    %c0_2 = arith.constant 0 : index
    %1 = vector.load %arg2[%c0_1, %c0_2] : memref<64x64xbf16, #tpu.memory_space<vmem>>, vector<64x64xbf16>
    %cst = arith.constant dense<0.000000e+00> : vector<8x64xf32>
    %2 = tpu.matmul %0, %1, %cst {dimension_numbers = #tpu.dot_dimension_numbers<[1], [0], [0], [1], [0, 0, 1, 1], [], []>} : vector<8x64xbf16>, vector<64x64xbf16>, vector<8x64xf32> -> vector<8x64xf32>
    %c0_3 = arith.constant 0 : index
    %c0_4 = arith.constant 0 : index
    %3 = vector.load %arg3[%c0_3, %c0_4] : memref<1x64xf32, #tpu.memory_space<vmem>>, vector<1x64xf32>
    %4 = vector.broadcast %3 : vector<1x64xf32> to vector<8x64xf32>
    %5 = arith.addf %2, %4 : vector<8x64xf32>
    %cst_5 = arith.constant 0.000000e+00 : f32
    %6 = vector.broadcast %cst_5 : f32 to vector<8x64xf32>
    %7 = arith.cmpf ogt, %5, %6 : vector<8x64xf32>
    %cst_6 = arith.constant 2.000000e-01 : f32
    %8 = vector.broadcast %cst_6 : f32 to vector<8x64xf32>
    %9 = arith.mulf %8, %5 : vector<8x64xf32>
    %10 = arith.select %7, %5, %9 : vector<8x64xi1>, vector<8x64xf32>
    %11 = arith.truncf %10 : vector<8x64xf32> to vector<8x64xbf16>
    %c0_7 = arith.constant 0 : index
    %c0_8 = arith.constant 0 : index
    %12 = vector.load %arg4[%c0_7, %c0_8] : memref<64x32xbf16, #tpu.memory_space<vmem>>, vector<64x32xbf16>
    %cst_9 = arith.constant dense<0.000000e+00> : vector<8x32xf32>
    %13 = tpu.matmul %11, %12, %cst_9 {dimension_numbers = #tpu.dot_dimension_numbers<[1], [0], [0], [1], [0, 0, 1, 1], [], []>} : vector<8x64xbf16>, vector<64x32xbf16>, vector<8x32xf32> -> vector<8x32xf32>
    %c0_10 = arith.constant 0 : index
    %c0_11 = arith.constant 0 : index
    %14 = vector.load %arg5[%c0_10, %c0_11] : memref<1x32xf32, #tpu.memory_space<vmem>>, vector<1x32xf32>
    %15 = vector.broadcast %14 : vector<1x32xf32> to vector<8x32xf32>
    %16 = arith.addf %13, %15 : vector<8x32xf32>
    %cst_12 = arith.constant 0.000000e+00 : f32
    %17 = vector.broadcast %cst_12 : f32 to vector<8x32xf32>
    %18 = arith.cmpf ogt, %16, %17 : vector<8x32xf32>
    %cst_13 = arith.constant 2.000000e-01 : f32
    %19 = vector.broadcast %cst_13 : f32 to vector<8x32xf32>
    %20 = arith.mulf %19, %16 : vector<8x32xf32>
    %21 = arith.select %18, %16, %20 : vector<8x32xi1>, vector<8x32xf32>
    %22 = arith.truncf %21 : vector<8x32xf32> to vector<8x32xbf16>
    %c0_14 = arith.constant 0 : index
    %c0_15 = arith.constant 0 : index
    %23 = vector.load %arg6[%c0_14, %c0_15] : memref<32x64xbf16, #tpu.memory_space<vmem>>, vector<32x64xbf16>
    %cst_16 = arith.constant dense<0.000000e+00> : vector<8x64xf32>
    %24 = tpu.matmul %22, %23, %cst_16 {dimension_numbers = #tpu.dot_dimension_numbers<[1], [0], [0], [1], [0, 0, 1, 1], [], []>} : vector<8x32xbf16>, vector<32x64xbf16>, vector<8x64xf32> -> vector<8x64xf32>
    %25 = vector.shape_cast %24 : vector<8x64xf32> to vector<8x16x4xf32>
    %cst_17 = arith.constant dense<0xFF800000> : vector<8x16xf32>
    %26 = vector.multi_reduction <maximumf>, %25, %cst_17 [2] : vector<8x16x4xf32> to vector<8x16xf32>
    %27 = vector.shape_cast %26 : vector<8x16xf32> to vector<8x16x1xf32>
    %28 = vector.broadcast %27 : vector<8x16x1xf32> to vector<8x16x4xf32>
    %29 = arith.subf %25, %28 : vector<8x16x4xf32>
    %30 = math.exp %29 : vector<8x16x4xf32>
    %cst_18 = arith.constant dense<0.000000e+00> : vector<8x16xf32>
    %31 = vector.multi_reduction <add>, %30, %cst_18 [2] : vector<8x16x4xf32> to vector<8x16xf32>
    %32 = vector.shape_cast %31 : vector<8x16xf32> to vector<8x16x1xf32>
    %33 = tpu.reciprocal %32 {approx = true} : vector<8x16x1xf32> -> vector<8x16x1xf32>
    %34 = vector.broadcast %33 : vector<8x16x1xf32> to vector<8x16x4xf32>
    %35 = arith.mulf %30, %34 : vector<8x16x4xf32>
    %36 = vector.shape_cast %35 : vector<8x16x4xf32> to vector<8x64xf32>
    %c0_19 = arith.constant 0 : index
    %c0_20 = arith.constant 0 : index
    %37 = vector.load %arg7[%c0_19, %c0_20] : memref<8x64xf32, #tpu.memory_space<vmem>>, vector<8x64xf32>
    tpu.vector_store %arg7[%c0_19, %c0_20], %36 {strides = array<i32>} : memref<8x64xf32, #tpu.memory_space<vmem>>, vector<8x64xf32>,
    return
  }
  func.func @transform_0(%arg0: i32) -> (i32, i32) {
    %c0_i32 = arith.constant 0 : i32
    %c0_i32_0 = arith.constant 0 : i32
    return %arg0, %c0_i32 : i32, i32
  }
  func.func @transform_1(%arg0: i32) -> (i32, i32) {
    %c0_i32 = arith.constant 0 : i32
    %c0_i32_0 = arith.constant 0 : i32
    %c0_i32_1 = arith.constant 0 : i32
    return %c0_i32, %c0_i32_0 : i32, i32
  }
  func.func @transform_2(%arg0: i32) -> (i32, i32) {
    %c0_i32 = arith.constant 0 : i32
    %c0_i32_0 = arith.constant 0 : i32
    %c0_i32_1 = arith.constant 0 : i32
    return %c0_i32, %c0_i32_0 : i32, i32
  }
  func.func @transform_3(%arg0: i32) -> (i32, i32) {
    %c0_i32 = arith.constant 0 : i32
    %c0_i32_0 = arith.constant 0 : i32
    %c0_i32_1 = arith.constant 0 : i32
    return %c0_i32, %c0_i32_0 : i32, i32
  }
  func.func @transform_4(%arg0: i32) -> (i32, i32) {
    %c0_i32 = arith.constant 0 : i32
    %c0_i32_0 = arith.constant 0 : i32
    %c0_i32_1 = arith.constant 0 : i32
    return %c0_i32, %c0_i32_0 : i32, i32
  }
  func.func @transform_5(%arg0: i32) -> (i32, i32) {
    %c0_i32 = arith.constant 0 : i32
    %c0_i32_0 = arith.constant 0 : i32
    %c0_i32_1 = arith.constant 0 : i32
    return %c0_i32, %c0_i32_0 : i32, i32
  }
  func.func @transform_6(%arg0: i32) -> (i32, i32) {
    %c0_i32 = arith.constant 0 : i32
    %c0_i32_0 = arith.constant 0 : i32
    return %arg0, %c0_i32 : i32, i32
  }
}

</mosaic_0001>

<bundles_post_ra>
// kernel: transition_forward.1
= control target key start
LH: loop header
LB: loop body
LE: loop exit
PB: predicated region body
PF: predicated region fallthrough
CT: control target
= control target key end

     0   :  { %v1286_v0 = vmov 0.0   ;;  %vm1287_vm0 = vmmov 0   ;;  %vm64_vm1 = vcmask 523264   ;;  %vm214_vm4 = vcmask 261120   ;;  %s1289_s19 = smov 124   ;;  %s1291_s20 = smov 120   ;;  %s1676_s1 = inlined_call_operand.vmem [shape: bf16[64,64], index: 1, kind: input, shape index: {}]   ;;  %s1677_s3 = inlined_call_operand.vmem [shape: bf16[64,32], index: 3, kind: input, shape index: {}]   ;;  %s1678_s0 = inlined_call_operand.vmem [shape: bf16[8,64], index: 0, kind: input, shape index: {}]   ;;  %s1679_s2 = inlined_call_operand.vmem [shape: f32[1,64], index: 2, kind: input, shape index: {}]   ;;  %s1680_s5 = inlined_call_operand.vmem [shape: bf16[32,64], index: 5, kind: input, shape index: {}]   ;;  %s1681_s4 = inlined_call_operand.vmem [shape: f32[1,32], index: 4, kind: input, shape index: {}]   ;;  %s1682_s6 = inlined_call_operand.vmem [shape: f32[8,64], index: 6, kind: output, shape index: {}]  }
   0x1   :  { %1146 = vmatprep.subr.bf16.mxu0 %v1286_v0  ;;  %v1212_v1 = vld [vmem:[%s1676_s1] sm:$0xff]   ;;  %1154 = vmatprep.mubr.msk.bf16.mxu0 %vm1287_vm0, %v1286_v0  ;;  %v1213_v2 = vld [vmem:[%s1676_s1 + $0x8] sm:$0xff]   ;;  %v1214_v4 = vld [vmem:[%s1676_s1 + $0x10] sm:$0xff]   ;;  %s1292_s21 = smov 104   ;;  %s1293_s22 = smov 108   ;;  %v309_v38 = vlaneseq  ;;  %vm576_vm5 = vcmask 31744  }
   0x2   :  { %1158 = vmatprep.subr.bf16.mxu1 %v1286_v0  ;;  %1166 = vmatprep.mubr.msk.bf16.mxu1 %vm1287_vm0, %v1286_v0  ;;  %v1216_v3 = vld [vmem:[%s1677_s3] sm:$0xff]   ;;  %v1217_v5 = vld [vmem:[%s1677_s3 + $0x8] sm:$0xff]   ;;  %v1215_v6 = vld [vmem:[%s1676_s1 + $0x18] sm:$0xff]   ;;  %s1294_s23 = smov 96   ;;  %s1295_s24 = smov 100   ;;  %vm1086_vm6 = vcmask 64512  }
   0x3   :  { %1147 = vmatpush3.bf16.msra.mxu0 %v1212_v1  ;;  %1159 = vmatpush3.bf16.msra.mxu1 %v1216_v3  ;;  %v24_v7 = vld [vmem:[%s1678_s0] sm:$0xf]  ;;  %v1218_v8 = vld [vmem:[%s1677_s3 + $0x10] sm:$0xff]   ;;  %v1219_v9 = vld [vmem:[%s1677_s3 + $0x18] sm:$0xff]   ;;  %s1296_s25 = smov 88   ;;  %s1297_s26 = smov 92  }
   0x4   :  { %1148 = vmatprep.subr.bf16.mxu0 %v1286_v0  ;;  %1160 = vmatprep.subr.bf16.mxu1 %v1286_v0  ;;  %v1118_v10 = vld [vmem:[%s1679_s2] ss:$0 sm:$0xff]  ;;  %v1221_v20 = vld [vmem:[%s1680_s5 + $0x8] sm:$0xff]   ;;  %s1298_s27 = smov 80   ;;  %s1299_s28 = smov 84   ;;  %v310_v42 = vshrl.u32 %v309_v38, 7 }
   0x5   :  { %v1220_v19 = vld [vmem:[%s1680_s5] sm:$0xff]   ;;  %s1288_s5 = smov 116   ;;  %s1300_s29 = smov 72   ;;  %v1303_v36 = vmov 1983009808   ;;  %vm1088_vm7 = vcmask 97280  }
   0x6   :  { %v1124_v21 = vld [vmem:[%s1681_s4] ss:$0 sm:$0xff]  ;;  %s1290_s4 = smov 112   ;;  %s1301_s30 = smov 76   ;;  %v307_v37 = vunpack.c.l.s4 %v1303_v36  ;;  %v1304_v43 = vmov 1934713408  }
   0x7   :  { %1149 = vmatpush3.bf16.msra.mxu0 %v1213_v2  ;;  %1161 = vmatpush3.bf16.msra.mxu1 %v1217_v5  ;;  %s1302_s7 = smov 68   ;;  %v371_v44 = vunpack.c.l.s4 %v1304_v43  ;;  %s1305_s8 = smov 8   ;;  %vm1090_vm8 = vcmask 130048   ;;  %vm1092_vm9 = vcmask 162816   ;;  %vm1094_vm10 = vcmask 195584  }
   0x8   :  { %1150 = vmatprep.subr.bf16.mxu0 %v1286_v0  ;;  %1162 = vmatprep.subr.bf16.mxu1 %v1286_v0  ;;  %v308_v41 = vunpack.c.0.s8 %v307_v37  ;;  %s1306_s9 = smov 4   ;;  %s1307_s10 = smov 12   ;;  %vm1096_vm11 = vcmask 228352   ;;  %vm1099_vm12 = vcmask 293888   ;;  %vm1101_vm13 = vcmask 326656  }
   0x9   :  { %v372_v50 = vunpack.c.0.s8 %v371_v44  ;;  %s1308_s11 = smov 16   ;;  %s1309_s12 = smov 20   ;;  %vm1103_vm14 = vcmask 359424   ;;  %vm1105_vm15 = vcmask 392192  }
   0xa   :  { %v1418_v48 = vsub.s32 %v308_v41, %v310_v42  ;;  %s1310_s1 = smov 24   ;;  %s1311_s13 = smov 28  }
   0xb   :  { %1151 = vmatpush3.bf16.msra.mxu0 %v1214_v4  ;;  %1163 = vmatpush3.bf16.msra.mxu1 %v1218_v8  ;;  %v1425_v61 = vsub.s32 %v372_v50, %v310_v42  ;;  %s1312_s14 = smov 36   ;;  %s1313_s15 = smov 32  }
   0xc   :  { %1152 = vmatprep.subr.bf16.mxu0 %v1286_v0  ;;  %1164 = vmatprep.subr.bf16.mxu1 %v1286_v0  ;;  %s1314_s0 = smov 44   ;;  %s1315_s16 = smov 40  }
   0xd   :  { %s1316_s3 = smov 52   ;;  %s1317_s17 = smov 48  }
   0xe   :  { %s1318_s2 = smov 60   ;;  %s1319_s18 = smov 56  }
   0xf   :  { %1153 = vmatpush3.bf16.msra.mxu0 %v1215_v6  ;;  %1165 = vmatpush3.bf16.msra.mxu1 %v1219_v9 }
  0x10   :  { %1170 = vmatprep.subr.bf16.mxu0 %v1286_v0 }
  0x12   :  { %1155 = vmatmul.mubr.msk.bf16.vlgmr.msra.gmra.mrb[0].mxu0 %vm64_vm1, %v24_v7 }
  0x13   :  { %1174 = vmatprep.mubr.msk.bf16.mxu0 %vm1287_vm0, %v1286_v0  ;;  %1171 = vmatpush3.bf16.msra.mxu0 %v1220_v19  ;;  %vm1107_vm0 = vcmask 424960  }
  0x14   :  { %1172 = vmatprep.subr.bf16.mxu0 %v1286_v0 }
  0x17   :  { %1173 = vmatpush3.bf16.msra.mxu0 %v1221_v20 }
  0xe5   :  { %v102_v11 = vpop.f32.mrb[0].mxu0 }
  0xe6   :  { %v103_v12 = vadd.f32 %v1118_v10, %v102_v11  ;;  %v1156_v13 = vpop.f32.mrb[1].mxu0 }
  0xe7   :  { %v105_v14 = vpop.f32.mrb[2].mxu0 }
  0xe8   :  { %vm108_vm2 = vcmp.gt.f32.partialorder %v103_v12, 0.0  ;;  %v109_v15 = vmul.f32 0.2, %v103_v12  ;;  %v1157_v16 = vpop.f32.mrb[3].mxu0 }
  0xea   :  { %v110_v17 = vsel %vm108_vm2, %v103_v12, %v109_v15  ;;  %vm1109_vm2 = vcmask 457728  }
  0xeb   :  { %v111_v18 = vpack.c.bf16 %v110_v17, %v110_v17 }
  0xed   :  { %1167 = vmatmul.mubr.msk.bf16.vlgmr.msra.gmra.mrb[0].mxu1 %vm64_vm1, %v111_v18 }
 0x1c0   :  { %v188_v22 = vpop.f32.mrb[0].mxu1 }
 0x1c1   :  { %v189_v23 = vadd.f32 %v1124_v21, %v188_v22  ;;  %v1168_v24 = vpop.f32.mrb[1].mxu1 }
 0x1c2   :  { %v191_v25 = vpop.f32.mrb[2].mxu1 }
 0x1c3   :  { %vm194_vm3 = vcmp.gt.f32.partialorder %v189_v23, 0.0  ;;  %v195_v26 = vmul.f32 0.2, %v189_v23  ;;  %v1169_v27 = vpop.f32.mrb[3].mxu1 }
 0x1c5   :  { %v196_v28 = vsel %vm194_vm3, %v189_v23, %v195_v26  ;;  %vm1111_vm3 = vcmask 490496  }
 0x1c6   :  { %v197_v29 = vpack.c.bf16 %v196_v28, %v196_v28 }
 0x1c8   :  { %1175 = vmatmul.mubr.msk.bf16.vlgmr.msra.gmra.mrb[4].mxu0 %vm214_vm4, %v197_v29 }
 0x29b   :  { %v1400_v30 = vpop.f32.mrb[4].mxu0 }
 0x29c   :  { %265 = vrot.lane.b32.xlu1 %v1400_v30, %s1288_s5  ;;  %259 = vrot.lane.b32.xlu0 %v1400_v30, %s1289_s19  ;;  %v1176_v31 = vpop.f32.mrb[5].mxu0 }
 0x29d   :  { %v255_v32 = vpop.f32.mrb[6].mxu0 }
 0x29e   :  { %v1177_v33 = vpop.f32.mrb[7].mxu0 }
 0x2a0   :  { %268 = vrot.lane.b32.xlu1 %v1400_v30, %s1290_s4  ;;  %262 = vrot.lane.b32.xlu0 %v1400_v30, %s1291_s20 }
 0x2a4   :  { %274 = vrot.lane.b32.xlu1 %v1400_v30, %s1292_s21  ;;  %271 = vrot.lane.b32.xlu0 %v1400_v30, %s1293_s22 }
 0x2a8   :  { %280 = vrot.lane.b32.xlu1 %v1400_v30, %s1294_s23  ;;  %277 = vrot.lane.b32.xlu0 %v1400_v30, %s1295_s24 }
 0x2ac   :  { %286 = vrot.lane.b32.xlu1 %v1400_v30, %s1296_s25  ;;  %283 = vrot.lane.b32.xlu0 %v1400_v30, %s1297_s26 }
 0x2b0   :  { %292 = vrot.lane.b32.xlu1 %v1400_v30, %s1298_s27  ;;  %289 = vrot.lane.b32.xlu0 %v1400_v30, %s1299_s28 }
 0x2b4   :  { %298 = vrot.lane.b32.xlu1 %v1400_v30, %s1300_s29  ;;  %295 = vrot.lane.b32.xlu0 %v1400_v30, %s1301_s30 }
 0x2b8   :  { %301 = vrot.lane.b32.xlu0 %v1400_v30, %s1302_s7 }
 0x30e   :  { %v266_v34 = vpop.permute.xlu1 %265  ;;  %v260_v35 = vpop.permute.xlu0 %259 }
 0x30f   :  { %v320_v49 = vcombine.low %v260_v35, %v266_v34  ;;  %v321_v60 = vcombine.high %v260_v35, %v266_v34 }
 0x311   :  { %v328_v57 = vrot.slane %v320_v49, %v1418_v48  ;;  %v335_v9 = vrot.slane %v321_v60, %v1418_v48 }
 0x312   :  { %v269_v39 = vpop.permute.xlu1 %268  ;;  %v263_v40 = vpop.permute.xlu0 %262 }
 0x313   :  { %v304_v45 = vcombine.low %v1400_v30, %v263_v40  ;;  %v305_v53 = vcombine.high %v1400_v30, %v263_v40 }
 0x315   :  { %v312_v51 = vrot.slane %v304_v45, %v1418_v48  ;;  %v319_v2 = vrot.slane %v305_v53, %v1418_v48 }
 0x316   :  { %v275_v46 = vpop.permute.xlu1 %274  ;;  %v272_v47 = vpop.permute.xlu0 %271 }
 0x317   :  { %v336_v52 = vcombine.low %v269_v39, %v275_v46  ;;  %v337_v54 = vcombine.high %v269_v39, %v275_v46  ;;  %v368_v62 = vcombine.low %v312_v51, %v328_v57  ;;  %v369_v6 = vcombine.high %v312_v51, %v328_v57 }
 0x318   :  { %v384_v14 = vcombine.low %v319_v2, %v335_v9  ;;  %v385_v27 = vcombine.high %v319_v2, %v335_v9 }
 0x319   :  { %v344_v63 = vrot.slane %v336_v52, %v1418_v48  ;;  %v351_v3 = vrot.slane %v337_v54, %v1418_v48  ;;  %v376_v11 = vrot.slane %v368_v62, %v1425_v61  ;;  %v383_v19 = vrot.slane %v369_v6, %v1425_v61 }
 0x31a   :  { %v1422_v55 = vpop.permute.xlu1 %280  ;;  %v278_v56 = vpop.permute.xlu0 %277  ;;  %v392_v31 = vrot.slane %v384_v14, %v1425_v61  ;;  %v399_v42 = vrot.slane %v385_v27, %v1425_v61 }
 0x31b   :  { %v352_v58 = vcombine.low %v272_v47, %v278_v56  ;;  %v353_v59 = vcombine.high %v272_v47, %v278_v56 }
 0x31d   :  { %v360_v0 = vrot.slane %v352_v58, %v1418_v48  ;;  %v367_v1 = vrot.slane %v353_v59, %v1418_v48 }
 0x31e   :  { %v1432_v4 = vpop.permute.xlu1 %286  ;;  %v284_v5 = vpop.permute.xlu0 %283 }
 0x31f   :  { %v400_v7 = vcombine.low %v344_v63, %v360_v0  ;;  %v401_v8 = vcombine.high %v344_v63, %v360_v0  ;;  %v416_v10 = vcombine.low %v351_v3, %v367_v1  ;;  %v417_v20 = vcombine.high %v351_v3, %v367_v1 }
 0x320   :  { %v440_v28 = vcombine.low %v1422_v55, %v1432_v4  ;;  %v441_v43 = vcombine.high %v1422_v55, %v1432_v4 }
 0x321   :  { %v408_v12 = vrot.slane %v400_v7, %v1425_v61  ;;  %v415_v13 = vrot.slane %v401_v8, %v1425_v61  ;;  %v424_v22 = vrot.slane %v416_v10, %v1425_v61  ;;  %v431_v35 = vrot.slane %v417_v20, %v1425_v61 }
 0x322   :  { %v293_v15 = vpop.permute.xlu1 %292  ;;  %v290_v16 = vpop.permute.xlu0 %289  ;;  %v448_v39 = vrot.slane %v440_v28, %v1418_v48  ;;  %v455_v62 = vrot.slane %v441_v43, %v1418_v48 }
 0x323   :  { %v1438_v17 = vcombine.high %v376_v11, %v408_v12  ;;  %v1440_v18 = vcombine.low %v376_v11, %v408_v12  ;;  %v456_v21 = vcombine.low %v284_v5, %v290_v16  ;;  %v1448_v25 = vcombine.low %v383_v19, %v415_v13 }
 0x324   :  { %v1450_v26 = vcombine.high %v383_v19, %v415_v13  ;;  %v1456_v33 = vcombine.low %v392_v31, %v424_v22  ;;  %v1458_v34 = vcombine.high %v392_v31, %v424_v22  ;;  %v457_v44 = vcombine.high %v284_v5, %v290_v16 }
 0x325   :  { %v583_v23 = vsel %vm576_vm5, %v1438_v17, -inf  ;;  %v577_v24 = vsel %vm576_vm5, %v1440_v18, -inf  ;;  %v464_v32 = vrot.slane %v456_v21, %v1418_v48  ;;  %v589_v37 = vsel %vm576_vm5, %v1448_v25, -inf }
 0x326   :  { %v299_v29 = vpop.permute.xlu1 %298  ;;  %584 = vmax.xlane.f32.xlu0 %v583_v23  ;;  %578 = vmax.xlane.f32.xlu1 %v577_v24  ;;  %v296_v30 = vpop.permute.xlu0 %295  ;;  %v595_v38 = vsel %vm576_vm5, %v1450_v26, -inf  ;;  %v601_v49 = vsel %vm576_vm5, %v1456_v33, -inf  ;;  %v607_v50 = vsel %vm576_vm5, %v1458_v34, -inf  ;;  %v1473_v51 = vcombine.low %v399_v42, %v431_v35 }
 0x327   :  { %v472_v36 = vcombine.low %v293_v15, %v299_v29  ;;  %v473_v40 = vcombine.high %v293_v15, %v299_v29  ;;  %v504_v47 = vcombine.low %v448_v39, %v464_v32  ;;  %v1478_v56 = vcombine.high %v399_v42, %v431_v35 }
 0x328   :  { %v471_v57 = vrot.slane %v457_v44, %v1418_v48  ;;  %v505_v58 = vcombine.high %v448_v39, %v464_v32  ;;  %v613_v1 = vsel %vm576_vm5, %v1473_v51, -inf }
 0x329   :  { %v480_v52 = vrot.slane %v472_v36, %v1418_v48  ;;  %v487_v55 = vrot.slane %v473_v40, %v1418_v48  ;;  %v512_v0 = vrot.slane %v504_v47, %v1425_v61  ;;  %v619_v2 = vsel %vm576_vm5, %v1478_v56, -inf }
 0x32a   :  { %590 = vmax.xlane.f32.xlu0 %v589_v37  ;;  %596 = vmax.xlane.f32.xlu1 %v595_v38  ;;  %v302_v41 = vpop.permute.xlu0 %301  ;;  %v520_v5 = vcombine.low %v455_v62, %v471_v57  ;;  %v519_v8 = vrot.slane %v505_v58, %v1425_v61  ;;  %v521_v15 = vcombine.high %v455_v62, %v471_v57 }
 0x32b   :  { %v488_v45 = vcombine.low %v296_v30, %v302_v41  ;;  %v489_v46 = vcombine.high %v296_v30, %v302_v41 }
 0x32c   :  { %v528_v16 = vrot.slane %v520_v5, %v1425_v61  ;;  %v535_v24 = vrot.slane %v521_v15, %v1425_v61 }
 0x32d   :  { %v496_v53 = vrot.slane %v488_v45, %v1418_v48  ;;  %v503_v54 = vrot.slane %v489_v46, %v1418_v48 }
 0x32e   :  { %602 = vmax.xlane.f32.xlu0 %v601_v49  ;;  %608 = vmax.xlane.f32.xlu1 %v607_v50 }
 0x32f   :  { %v536_v59 = vcombine.low %v480_v52, %v496_v53  ;;  %v537_v60 = vcombine.high %v480_v52, %v496_v53  ;;  %v552_v63 = vcombine.low %v487_v55, %v503_v54  ;;  %v553_v9 = vcombine.high %v487_v55, %v503_v54 }
 0x331   :  { %v544_v3 = vrot.slane %v536_v59, %v1425_v61  ;;  %v551_v4 = vrot.slane %v537_v60, %v1425_v61  ;;  %v560_v10 = vrot.slane %v552_v63, %v1425_v61  ;;  %v567_v19 = vrot.slane %v553_v9, %v1425_v61 }
 0x332   :  { %614 = vmax.xlane.f32.xlu0 %v613_v1  ;;  %620 = vmax.xlane.f32.xlu1 %v619_v2 }
 0x333   :  { %v1490_v6 = vcombine.high %v512_v0, %v544_v3  ;;  %v1492_v7 = vcombine.low %v512_v0, %v544_v3  ;;  %v1500_v13 = vcombine.high %v519_v8, %v551_v4  ;;  %v1502_v14 = vcombine.low %v519_v8, %v551_v4 }
 0x334   :  { %v1510_v22 = vcombine.high %v528_v16, %v560_v10  ;;  %v1512_v23 = vcombine.low %v528_v16, %v560_v10  ;;  %v1519_v29 = vcombine.high %v535_v24, %v567_v19  ;;  %v1521_v30 = vcombine.low %v535_v24, %v567_v19 }
 0x335   :  { %v586_v11 = vsel %vm576_vm5, %v1490_v6, -inf  ;;  %v580_v12 = vsel %vm576_vm5, %v1492_v7, -inf  ;;  %v598_v20 = vsel %vm576_vm5, %v1500_v13, -inf  ;;  %v592_v21 = vsel %vm576_vm5, %v1502_v14, -inf }
 0x336   :  { %587 = vmax.xlane.f32.xlu1 %v586_v11  ;;  %581 = vmax.xlane.f32.xlu0 %v580_v12  ;;  %v610_v27 = vsel %vm576_vm5, %v1510_v22, -inf  ;;  %v604_v28 = vsel %vm576_vm5, %v1512_v23, -inf  ;;  %v622_v31 = vsel %vm576_vm5, %v1519_v29, -inf  ;;  %v616_v32 = vsel %vm576_vm5, %v1521_v30, -inf }
 0x33a   :  { %599 = vmax.xlane.f32.xlu1 %v598_v20  ;;  %593 = vmax.xlane.f32.xlu0 %v592_v21 }
 0x33e   :  { %611 = vmax.xlane.f32.xlu1 %v610_v27  ;;  %605 = vmax.xlane.f32.xlu0 %v604_v28 }
 0x342   :  { %623 = vmax.xlane.f32.xlu1 %v622_v31  ;;  %617 = vmax.xlane.f32.xlu0 %v616_v32 }
 0x3b3   :  { %v579_v35 = vpop.xlane.xlu1 %578  ;;  %v585_v36 = vpop.xlane.xlu0 %584 }
 0x3b4   :  { %v625_v37 = vsub.f32 %v1440_v18, %v579_v35  ;;  %v627_v38 = vsub.f32 %v1438_v17, %v585_v36 }
 0x3b6   :  { %v641_v39 = vmul.f32 1.442695, %v625_v37  ;;  %v645_v40 = vmul.f32 1.442695, %v627_v38 }
 0x3b7   :  { %v597_v41 = vpop.xlane.xlu1 %596  ;;  %v591_v42 = vpop.xlane.xlu0 %590 }
 0x3b8   :  { %1222 = vpow2.f32 %v641_v39  ;;  %v631_v43 = vsub.f32 %v1450_v26, %v597_v41  ;;  %v629_v44 = vsub.f32 %v1448_v25, %v591_v42 }
 0x3b9   :  { %1224 = vpow2.f32 %v645_v40 }
 0x3ba   :  { %v653_v45 = vmul.f32 1.442695, %v631_v43  ;;  %v649_v46 = vmul.f32 1.442695, %v629_v44 }
 0x3bb   :  { %v609_v47 = vpop.xlane.xlu1 %608  ;;  %v603_v49 = vpop.xlane.xlu0 %602 }
 0x3bc   :  { %1226 = vpow2.f32 %v653_v45  ;;  %v635_v50 = vsub.f32 %v1458_v34, %v609_v47  ;;  %v633_v18 = vsub.f32 %v1456_v33, %v603_v49 }
 0x3bd   :  { %1228 = vpow2.f32 %v649_v46 }
 0x3be   :  { %v661_v17 = vmul.f32 1.442695, %v635_v50  ;;  %v657_v52 = vmul.f32 1.442695, %v633_v18 }
 0x3bf   :  { %v621_v53 = vpop.xlane.xlu1 %620  ;;  %v615_v54 = vpop.xlane.xlu0 %614 }
 0x3c0   :  { %1230 = vpow2.f32 %v661_v17  ;;  %v639_v26 = vsub.f32 %v1478_v56, %v621_v53  ;;  %v637_v25 = vsub.f32 %v1473_v51, %v615_v54 }
 0x3c1   :  { %1232 = vpow2.f32 %v657_v52 }
 0x3c2   :  { %v1535_v55 = vpop.eup %1222  ;;  %v669_v57 = vmul.f32 1.442695, %v639_v26  ;;  %v665_v58 = vmul.f32 1.442695, %v637_v25 }
 0x3c3   :  { %v1537_v59 = vpop.eup %1224  ;;  %v588_v34 = vpop.xlane.xlu1 %587  ;;  %v673_v33 = vsel %vm576_vm5, %v1535_v55, 0.0 }
 0x3c4   :  { %v582_v60 = vpop.xlane.xlu0 %581  ;;  %1234 = vpow2.f32 %v669_v57  ;;  %v628_v62 = vsub.f32 %v1490_v6, %v588_v34  ;;  %674 = vadd.xlane.f32.xlu0 %v673_v33  ;;  %v679_v51 = vsel %vm576_vm5, %v1537_v59, 0.0 }
 0x3c5   :  { %v626_v63 = vsub.f32 %v1492_v7, %v582_v60  ;;  %1236 = vpow2.f32 %v665_v58  ;;  %680 = vadd.xlane.f32.xlu1 %v679_v51 }
 0x3c6   :  { %v1545_v56 = vpop.eup %1226  ;;  %v647_v0 = vmul.f32 1.442695, %v628_v62 }
 0x3c7   :  { %v643_v1 = vmul.f32 1.442695, %v626_v63  ;;  %v1547_v2 = vpop.eup %1228  ;;  %v600_v3 = vpop.xlane.xlu1 %599  ;;  %v691_v5 = vsel %vm576_vm5, %v1545_v56, 0.0 }
 0x3c8   :  { %v594_v4 = vpop.xlane.xlu0 %593  ;;  %1238 = vpow2.f32 %v647_v0  ;;  %v632_v6 = vsub.f32 %v1500_v13, %v600_v3  ;;  %v685_v8 = vsel %vm576_vm5, %v1547_v2, 0.0 }
 0x3c9   :  { %v630_v7 = vsub.f32 %v1502_v14, %v594_v4  ;;  %1240 = vpow2.f32 %v643_v1  ;;  %692 = vadd.xlane.f32.xlu1 %v691_v5  ;;  %686 = vadd.xlane.f32.xlu0 %v685_v8 }
 0x3ca   :  { %v1555_v9 = vpop.eup %1230  ;;  %v655_v10 = vmul.f32 1.442695, %v632_v6 }
 0x3cb   :  { %v651_v11 = vmul.f32 1.442695, %v630_v7  ;;  %v1557_v12 = vpop.eup %1232  ;;  %v612_v15 = vpop.xlane.xlu1 %611  ;;  %v703_v19 = vsel %vm576_vm5, %v1555_v9, 0.0 }
 0x3cc   :  { %v606_v16 = vpop.xlane.xlu0 %605  ;;  %1242 = vpow2.f32 %v655_v10  ;;  %v636_v13 = vsub.f32 %v1510_v22, %v612_v15  ;;  %v697_v20 = vsel %vm576_vm5, %v1557_v12, 0.0 }
 0x3cd   :  { %v634_v14 = vsub.f32 %v1512_v23, %v606_v16  ;;  %1244 = vpow2.f32 %v651_v11  ;;  %704 = vadd.xlane.f32.xlu1 %v703_v19  ;;  %698 = vadd.xlane.f32.xlu0 %v697_v20 }
 0x3ce   :  { %v1565_v21 = vpop.eup %1234  ;;  %v663_v24 = vmul.f32 1.442695, %v636_v13 }
 0x3cf   :  { %v659_v27 = vmul.f32 1.442695, %v634_v14  ;;  %v1567_v28 = vpop.eup %1236  ;;  %v624_v31 = vpop.xlane.xlu1 %623  ;;  %v715_v35 = vsel %vm576_vm5, %v1565_v21, 0.0 }
 0x3d0   :  { %v618_v32 = vpop.xlane.xlu0 %617  ;;  %1246 = vpow2.f32 %v663_v24  ;;  %v640_v22 = vsub.f32 %v1519_v29, %v624_v31  ;;  %v709_v36 = vsel %vm576_vm5, %v1567_v28, 0.0 }
 0x3d1   :  { %v638_v23 = vsub.f32 %v1521_v30, %v618_v32  ;;  %1248 = vpow2.f32 %v659_v27  ;;  %716 = vadd.xlane.f32.xlu1 %v715_v35  ;;  %710 = vadd.xlane.f32.xlu0 %v709_v36 }
 0x3d2   :  { %v1575_v37 = vpop.eup %1238  ;;  %v671_v38 = vmul.f32 1.442695, %v640_v22 }
 0x3d3   :  { %v667_v39 = vmul.f32 1.442695, %v638_v23  ;;  %v1577_v40 = vpop.eup %1240  ;;  %v682_v41 = vsel %vm576_vm5, %v1575_v37, 0.0 }
 0x3d4   :  { %1250 = vpow2.f32 %v671_v38  ;;  %v676_v29 = vsel %vm576_vm5, %v1577_v40, 0.0 }
 0x3d5   :  { %1252 = vpow2.f32 %v667_v39  ;;  %683 = vadd.xlane.f32.xlu1 %v682_v41  ;;  %677 = vadd.xlane.f32.xlu0 %v676_v29 }
 0x3d6   :  { %v1583_v30 = vpop.eup %1242 }
 0x3d7   :  { %v1585_v42 = vpop.eup %1244  ;;  %v694_v43 = vsel %vm576_vm5, %v1583_v30, 0.0 }
 0x3d8   :  { %v688_v44 = vsel %vm576_vm5, %v1585_v42, 0.0 }
 0x3d9   :  { %695 = vadd.xlane.f32.xlu1 %v694_v43  ;;  %689 = vadd.xlane.f32.xlu0 %v688_v44 }
 0x3da   :  { %v1591_v45 = vpop.eup %1246 }
 0x3db   :  { %v1593_v46 = vpop.eup %1248  ;;  %v706_v47 = vsel %vm576_vm5, %v1591_v45, 0.0 }
 0x3dc   :  { %v700_v49 = vsel %vm576_vm5, %v1593_v46, 0.0 }
 0x3dd   :  { %707 = vadd.xlane.f32.xlu1 %v706_v47  ;;  %701 = vadd.xlane.f32.xlu0 %v700_v49 }
 0x3de   :  { %v1599_v50 = vpop.eup %1250 }
 0x3df   :  { %v1601_v18 = vpop.eup %1252  ;;  %v718_v17 = vsel %vm576_vm5, %v1599_v50, 0.0 }
 0x3e0   :  { %v712_v52 = vsel %vm576_vm5, %v1601_v18, 0.0 }
 0x3e1   :  { %719 = vadd.xlane.f32.xlu1 %v718_v17  ;;  %713 = vadd.xlane.f32.xlu0 %v712_v52 }
 0x451   :  { %v675_v53 = vpop.xlane.xlu0 %674 }
 0x452   :  { %v681_v54 = vpop.xlane.xlu1 %680  ;;  %1254 = vrcp.f32 %v675_v53 }
 0x453   :  { %1256 = vrcp.f32 %v681_v54 }
 0x456   :  { %v693_v26 = vpop.xlane.xlu1 %692  ;;  %v687_v25 = vpop.xlane.xlu0 %686 }
 0x457   :  { %1258 = vrcp.f32 %v693_v26 }
 0x458   :  { %1260 = vrcp.f32 %v687_v25 }
 0x45a   :  { %v705_v57 = vpop.xlane.xlu1 %704  ;;  %v699_v58 = vpop.xlane.xlu0 %698 }
 0x45b   :  { %1262 = vrcp.f32 %v705_v57 }
 0x45c   :  { %1264 = vrcp.f32 %v699_v58  ;;  %v1255_v33 = vpop.eup %1254 }
 0x45d   :  { %v1257_v62 = vpop.eup %1256  ;;  %v737_v6 = vmul.f32 %v1255_v33, %v1535_v55 }
 0x45e   :  { %v717_v34 = vpop.xlane.xlu1 %716  ;;  %v711_v60 = vpop.xlane.xlu0 %710  ;;  %v739_v5 = vmul.f32 %v1257_v62, %v1537_v59 }
 0x45f   :  { %1266 = vrcp.f32 %v717_v34 }
 0x460   :  { %1268 = vrcp.f32 %v711_v60 }
 0x461   :  { %v1259_v63 = vpop.eup %1258 }
 0x462   :  { %v1261_v51 = vpop.eup %1260  ;;  %v743_v0 = vmul.f32 %v1259_v63, %v1545_v56  ;;  %v684_v1 = vpop.xlane.xlu1 %683 }
 0x463   :  { %v678_v3 = vpop.xlane.xlu0 %677  ;;  %v741_v4 = vmul.f32 %v1261_v51, %v1547_v2  ;;  %1270 = vrcp.f32 %v684_v1 }
 0x464   :  { %1272 = vrcp.f32 %v678_v3  ;;  %v769_v11 = vcombine.low %v739_v5, %v743_v0  ;;  %v770_v19 = vcombine.high %v739_v5, %v743_v0 }
 0x465   :  { %v753_v10 = vcombine.low %v737_v6, %v741_v4  ;;  %v1263_v15 = vpop.eup %1262  ;;  %v754_v13 = vcombine.high %v737_v6, %v741_v4 }
 0x466   :  { %v696_v7 = vpop.xlane.xlu1 %695  ;;  %v1265_v16 = vpop.eup %1264  ;;  %v747_v2 = vmul.f32 %v1263_v15, %v1555_v9  ;;  %v777_v27 = vrot.slane %v769_v11, %v1418_v48  ;;  %v784_v22 = vrot.slane %v770_v19, %v1418_v48 }
 0x467   :  { %v690_v8 = vpop.xlane.xlu0 %689  ;;  %1274 = vrcp.f32 %v696_v7  ;;  %v761_v24 = vrot.slane %v753_v10, %v1418_v48  ;;  %v745_v31 = vmul.f32 %v1265_v16, %v1557_v12  ;;  %v768_v9 = vrot.slane %v754_v13, %v1418_v48 }
 0x468   :  { %1276 = vrcp.f32 %v690_v8 }
 0x469   :  { %v1267_v56 = vpop.eup %1266  ;;  %v818_v29 = vcombine.high %v761_v24, %v777_v27  ;;  %v817_v43 = vcombine.low %v761_v24, %v777_v27  ;;  %v833_v58 = vcombine.low %v768_v9, %v784_v22  ;;  %v834_v5 = vcombine.high %v768_v9, %v784_v22 }
 0x46a   :  { %v1269_v14 = vpop.eup %1268  ;;  %v751_v59 = vmul.f32 %v1267_v56, %v1565_v21  ;;  %v708_v20 = vpop.xlane.xlu1 %707 }
 0x46b   :  { %v702_v55 = vpop.xlane.xlu0 %701  ;;  %v749_v32 = vmul.f32 %v1269_v14, %v1567_v28  ;;  %1278 = vrcp.f32 %v708_v20  ;;  %v832_v25 = vrot.slane %v818_v29, %v1425_v61  ;;  %v1625_v57 = vrot.slane %v817_v43, %v1425_v61 }
 0x46c   :  { %v801_v35 = vcombine.low %v747_v2, %v751_v59  ;;  %v802_v23 = vcombine.high %v747_v2, %v751_v59  ;;  %1280 = vrcp.f32 %v702_v55  ;;  %v841_v6 = vrot.slane %v833_v58, %v1425_v61 }
 0x46d   :  { %v785_v36 = vcombine.low %v745_v31, %v749_v32  ;;  %v786_v21 = vcombine.high %v745_v31, %v749_v32  ;;  %v1271_v44 = vpop.eup %1270  ;;  %v848_v14 = vrot.slane %v834_v5, %v1425_v61 }
 0x46e   :  { %v720_v38 = vpop.xlane.xlu1 %719  ;;  %v809_v41 = vrot.slane %v801_v35, %v1418_v48  ;;  %v816_v12 = vrot.slane %v802_v23, %v1418_v48  ;;  %v1273_v49 = vpop.eup %1272  ;;  %v740_v63 = vmul.f32 %v1271_v44, %v1575_v37 }
 0x46f   :  { %v714_v39 = vpop.xlane.xlu0 %713  ;;  %1282 = vrcp.f32 %v720_v38  ;;  %v793_v28 = vrot.slane %v785_v36, %v1418_v48  ;;  %v800_v47 = vrot.slane %v786_v21, %v1418_v48  ;;  %v738_v51 = vmul.f32 %v1273_v49, %v1577_v40 }
 0x470   :  { %1284 = vrcp.f32 %v714_v39 }
 0x471   :  { %v1275_v17 = vpop.eup %1274  ;;  %v850_v52 = vcombine.high %v793_v28, %v809_v41  ;;  %v849_v53 = vcombine.low %v793_v28, %v809_v41  ;;  %v865_v54 = vcombine.low %v800_v47, %v816_v12  ;;  %v866_v4 = vcombine.high %v800_v47, %v816_v12 }
 0x472   :  { %v1277_v26 = vpop.eup %1276  ;;  %v744_v34 = vmul.f32 %v1275_v17, %v1583_v30 }
 0x473   :  { %v1629_v60 = vmul.f32 %v1277_v26, %v1585_v42  ;;  %v864_v33 = vrot.slane %v850_v52, %v1425_v61  ;;  %v1633_v62 = vrot.slane %v849_v53, %v1425_v61  ;;  %v873_v3 = vrot.slane %v865_v54, %v1425_v61 }
 0x474   :  { %v905_v7 = vcombine.low %v740_v63, %v744_v34  ;;  %v880_v15 = vrot.slane %v866_v4, %v1425_v61  ;;  %v906_v32 = vcombine.high %v740_v63, %v744_v34 }
 0x475   :  { %v883_v0 = vcombine.low %v832_v25, %v864_v33  ;;  %v882_v1 = vcombine.high %v1625_v57, %v1633_v62  ;;  %v1279_v30 = vpop.eup %1278  ;;  %v889_v37 = vcombine.low %v738_v51, %v1629_v60  ;;  %v881_v40 = vcombine.low %v1625_v57, %v1633_v62 }
 0x476   :  { %v1281_v42 = vpop.eup %1280  ;;  %v884_v10 = vcombine.high %v832_v25, %v864_v33  ;;  %v885_v11 = vcombine.low %v841_v6, %v873_v3  ;;  %v748_v19 = vmul.f32 %v1279_v30, %v1591_v45  ;;  %v913_v20 = vrot.slane %v905_v7, %v1418_v48 }
 0x477   :  { %1030 = vrot.lane.b32.xlu1 %v883_v0, %s1305_s8  ;;  %1026 = vrot.lane.b32.xlu0 %v882_v1, %s1306_s9  ;;  %v746_v56 = vmul.f32 %v1281_v42, %v1593_v46  ;;  %v897_v59 = vrot.slane %v889_v37, %v1418_v48  ;;  %v886_v55 = vcombine.high %v841_v6, %v873_v3 }
 0x478   :  { %v887_v27 = vcombine.low %v848_v14, %v880_v15  ;;  %v890_v22 = vcombine.high %v738_v51, %v1629_v60  ;;  %v888_v23 = vcombine.high %v848_v14, %v880_v15  ;;  %v920_v39 = vrot.slane %v906_v32, %v1418_v48 }
 0x479   :  { %v1283_v8 = vpop.eup %1282  ;;  %v953_v35 = vcombine.low %v897_v59, %v913_v20  ;;  %v954_v43 = vcombine.high %v897_v59, %v913_v20 }
 0x47a   :  { %v1285_v16 = vpop.eup %1284  ;;  %v752_v13 = vmul.f32 %v1283_v8, %v1599_v50  ;;  %v904_v12 = vrot.slane %v890_v22, %v1418_v48 }
 0x47b   :  { %v750_v2 = vmul.f32 %v1285_v16, %v1601_v18  ;;  %1034 = vrot.lane.b32.xlu1 %v884_v10, %s1307_s10  ;;  %1038 = vrot.lane.b32.xlu0 %v885_v11, %s1308_s11  ;;  %v961_v41 = vrot.slane %v953_v35, %v1425_v61  ;;  %v968_v17 = vrot.slane %v954_v43, %v1425_v61 }
 0x47c   :  { %v937_v24 = vcombine.low %v748_v19, %v752_v13  ;;  %v938_v46 = vcombine.high %v748_v19, %v752_v13  ;;  %v969_v52 = vcombine.low %v904_v12, %v920_v39  ;;  %v970_v58 = vcombine.high %v904_v12, %v920_v39 }
 0x47d   :  { %v921_v45 = vcombine.low %v746_v56, %v750_v2  ;;  %v922_v31 = vcombine.high %v746_v56, %v750_v2 }
 0x47e   :  { %v945_v50 = vrot.slane %v937_v24, %v1418_v48  ;;  %v952_v38 = vrot.slane %v938_v46, %v1418_v48  ;;  %v984_v63 = vrot.slane %v970_v58, %v1425_v61 }
 0x47f   :  { %1042 = vrot.lane.b32.xlu1 %v886_v55, %s1309_s12  ;;  %1046 = vrot.lane.b32.xlu0 %v887_v27, %s1310_s1  ;;  %v929_v18 = vrot.slane %v921_v45, %v1418_v48  ;;  %v936_v21 = vrot.slane %v922_v31, %v1418_v48  ;;  %v977_v48 = vrot.slane %v969_v52, %v1425_v61 }
 0x481   :  { %v985_v36 = vcombine.low %v929_v18, %v945_v50  ;;  %v986_v9 = vcombine.high %v929_v18, %v945_v50  ;;  %v1001_v49 = vcombine.low %v936_v21, %v952_v38  ;;  %v1002_v25 = vcombine.high %v936_v21, %v952_v38 }
 0x483   :  { %1050 = vrot.lane.b32.xlu1 %v888_v23, %s1311_s13  ;;  %v993_v29 = vrot.slane %v985_v36, %v1425_v61  ;;  %v1000_v47 = vrot.slane %v986_v9, %v1425_v61  ;;  %v1009_v26 = vrot.slane %v1001_v49, %v1425_v61  ;;  %v1016_v33 = vrot.slane %v1002_v25, %v1425_v61 }
 0x485   :  { %v1018_v44 = vcombine.high %v961_v41, %v993_v29  ;;  %v1017_v28 = vcombine.low %v961_v41, %v993_v29  ;;  %v1020_v53 = vcombine.high %v968_v17, %v1000_v47  ;;  %v1019_v54 = vcombine.low %v968_v17, %v1000_v47 }
 0x486   :  { %v1022_v34 = vcombine.high %v977_v48, %v1009_v26  ;;  %v1021_v60 = vcombine.low %v977_v48, %v1009_v26  ;;  %v1024_v51 = vcombine.high %v984_v63, %v1016_v33  ;;  %v1023_v0 = vcombine.low %v984_v63, %v1016_v33 }
 0x487   :  { %1058 = vrot.lane.b32.xlu1 %v1018_v44, %s1312_s14  ;;  %1054 = vrot.lane.b32.xlu0 %v1017_v28, %s1313_s15 }
 0x48b   :  { %1066 = vrot.lane.b32.xlu1 %v1020_v53, %s1314_s0  ;;  %1062 = vrot.lane.b32.xlu0 %v1019_v54, %s1315_s16 }
 0x48f   :  { %1074 = vrot.lane.b32.xlu1 %v1022_v34, %s1316_s3  ;;  %1070 = vrot.lane.b32.xlu0 %v1021_v60, %s1317_s17 }
 0x493   :  { %1082 = vrot.lane.b32.xlu1 %v1024_v51, %s1318_s2  ;;  %1078 = vrot.lane.b32.xlu0 %v1023_v0, %s1319_s18 }
 0x4e9   :  { %v1031_v1 = vpop.permute.xlu1 %1030  ;;  %v1027_v3 = vpop.permute.xlu0 %1026 }
 0x4ea   :  { %v1085_v4 = vsel %vm576_vm5, %v881_v40, %v1027_v3 }
 0x4eb   :  { %v1087_v42 = vsel %vm1086_vm6, %v1085_v4, %v1031_v1 }
 0x4ed   :  { %v1035_v30 = vpop.permute.xlu1 %1034  ;;  %v1039_v5 = vpop.permute.xlu0 %1038 }
 0x4ee   :  { %v1089_v6 = vsel %vm1088_vm7, %v1087_v42, %v1035_v30 }
 0x4ef   :  { %v1091_v37 = vsel %vm1090_vm8, %v1089_v6, %v1039_v5 }
 0x4f1   :  { %v1043_v61 = vpop.permute.xlu1 %1042  ;;  %v1047_v8 = vpop.permute.xlu0 %1046 }
 0x4f2   :  { %v1093_v7 = vsel %vm1092_vm9, %v1091_v37, %v1043_v61 }
 0x4f3   :  { %v1095_v11 = vsel %vm1094_vm10, %v1093_v7, %v1047_v8 }
 0x4f5   :  { %v1051_v10 = vpop.permute.xlu1 %1050 }
 0x4f6   :  { %v1097_v15 = vsel %vm1096_vm11, %v1095_v11, %v1051_v10 }
 0x4f9   :  { %v1059_v57 = vpop.permute.xlu1 %1058  ;;  %v1055_v62 = vpop.permute.xlu0 %1054 }
 0x4fa   :  { %v1098_v40 = vsel %vm214_vm4, %v1097_v15, %v1055_v62 }
 0x4fb   :  { %v1100_v19 = vsel %vm1099_vm12, %v1098_v40, %v1059_v57 }
 0x4fd   :  { %v1067_v16 = vpop.permute.xlu1 %1066  ;;  %v1063_v56 = vpop.permute.xlu0 %1062 }
 0x4fe   :  { %v1102_v13 = vsel %vm1101_vm13, %v1100_v19, %v1063_v56 }
 0x4ff   :  { %v1104_v2 = vsel %vm1103_vm14, %v1102_v13, %v1067_v16 }
 0x501   :  { %v1075_v14 = vpop.permute.xlu1 %1074  ;;  %v1071_v59 = vpop.permute.xlu0 %1070 }
 0x502   :  { %v1106_v20 = vsel %vm1105_vm15, %v1104_v2, %v1071_v59 }
 0x503   :  { %v1108_v24 = vsel %vm1107_vm0, %v1106_v20, %v1075_v14 }
 0x505   :  { %v1083_v55 = vpop.permute.xlu1 %1082  ;;  %v1079_v27 = vpop.permute.xlu0 %1078 }
 0x506   :  { %v1110_v45 = vsel %vm1109_vm2, %v1108_v24, %v1079_v27 }
 0x507   :  { %v1112_v31 = vsel %vm1111_vm3, %v1110_v45, %v1083_v55 }
 0x508   :  { %1113 = vst.msk [vmem:[%s1682_s6] sm:$0xff] %vm64_vm1, %v1112_v31 }

</bundles_post_ra>
